<compile_context>
chip_gen: v6e
topology: v6e:2x2x1
jax: 0.10.0
libtpu: 0.0.40
codegen_flags: <defaults>
</compile_context>

<pallas_src>
import jax
import jax.numpy as jnp
from jax import lax
from jax.experimental import pallas as pl
from jax.experimental.pallas import tpu as pltpu


def _round_up(x, m):
    return ((x + m - 1) // m) * m


def _largest_divisor(n, cap):
    best = 1
    for d in range(1, min(n, cap) + 1):
        if n % d == 0:
            best = d
    return best


def rnn_kernel(emb_ref, w_ih_ref, w_hh_ref, b_ref, w_fc_ref, b_fc_ref,
               out_ref, h_scratch, xw_scratch):
    """One time-chunk of the recurrence.

    emb_ref : (Tt*Bp, Ep) time-major embedded inputs for the current chunk (flattened)
    w_ih_ref: (Ep, Hp)    input->hidden weight (pre-transposed, zero-padded)
    w_hh_ref: (Hp, Hp)    hidden->hidden weight
    b_ref   : (1, Hp)     combined bias b_ih + b_hh
    w_fc_ref: (Hp, Op)    fc weight (pre-transposed)
    b_fc_ref: (1, Op)     fc bias
    out_ref : (Bp, Op)    logits for the last time step (written on last chunk only)
    h_scratch : (Bp, Hp) f32 VMEM    hidden state carried across grid steps
    xw_scratch: (Tt*Bp, Hp) f32 VMEM precomputed x @ W_ih + b for the chunk
    """
    tb, _ = emb_ref.shape
    bp, hp = h_scratch.shape
    t_chunk = tb // bp

    # h_0 = zeros (matches init_hidden()) -- only before the first chunk.
    @pl.when(pl.program_id(0) == 0)
    def _():
        h_scratch[...] = jnp.zeros_like(h_scratch)

    # Hoisted input projection: one batched MXU matmul for the whole chunk, with the
    # bias folded in here (off the serial critical path) instead of inside the loop.
    xw_scratch[...] = (
        jnp.dot(emb_ref[...], w_ih_ref[...], preferred_element_type=jnp.float32)
        + b_ref[...]
    )

    w_hh = w_hh_ref[...]

    def step(t, h):
        off = pl.multiple_of(t * bp, bp)
        xt = xw_scratch[pl.ds(off, bp), :]
        # Only h @ W_hh + add + tanh remain on the serial dependence chain.
        return jnp.tanh(
            xt + jnp.dot(h, w_hh, preferred_element_type=jnp.float32))

    # Hidden state carried in registers; short fixed trip count -> unroll
    # (gives the LLO scheduler full visibility across steps).
    h = lax.fori_loop(0, t_chunk, step, h_scratch[...], unroll=True)
    h_scratch[...] = h

    # out = fc(h_T), only after the last chunk; output block stays resident.
    @pl.when(pl.program_id(0) == pl.num_programs(0) - 1)
    def _():
        out_ref[...] = (
            jnp.dot(h, w_fc_ref[...], preferred_element_type=jnp.float32)
            + b_fc_ref[...]
        )


def rnn_forward(x_tokens, params, time_chunk=None):
    """x_tokens: int32 (B, T).  Returns logits (B, O)."""
    emb_table = params["emb"]          # (V, E)
    w_ih = params["w_ih"]              # (E, H)
    w_hh = params["w_hh"]              # (H, H)
    b = params["b"]                    # (1, H)
    w_fc = params["w_fc"]              # (H, O)
    b_fc = params["b_fc"]              # (1, O)

    B, T = x_tokens.shape
    E = emb_table.shape[1]
    H = w_hh.shape[0]
    O = w_fc.shape[1]

    # Pad to hardware tiles: batch -> sublane multiple (8), feature dims -> lane (128).
    Bp = _round_up(B, 8)
    Ep = _round_up(E, 128)
    Hp = _round_up(H, 128)
    Op = _round_up(O, 128)

    if time_chunk is None:
        # Keep the per-chunk emb block modest so double-buffering fits scoped VMEM on
        # all generations (v5e default 16 MiB, v7x 32 MiB) and the unrolled recurrence
        # stays a reasonable code size.
        time_chunk = _largest_divisor(T, cap=64)
    assert T % time_chunk == 0, "time_chunk must divide T"
    n_chunks = T // time_chunk

    # Embedding lookup (gather) is glue -- done in plain JAX.
    # TODO(synk): data-dependent embedding gather stays outside the kernel (jnp.take).
    emb = jnp.take(emb_table, x_tokens, axis=0)          # (B, T, E)
    emb_tm = jnp.transpose(emb, (1, 0, 2))               # (T, B, E) time-major
    emb_tm = jnp.pad(emb_tm, ((0, 0), (0, Bp - B), (0, Ep - E)))
    emb_flat = emb_tm.reshape(T * Bp, Ep)                # lane-dense 2-D slab

    # Zero-pad weights once per call (cheap; padded lanes stay exactly zero).
    w_ih_p = jnp.pad(w_ih, ((0, Ep - E), (0, Hp - H)))
    w_hh_p = jnp.pad(w_hh, ((0, Hp - H), (0, Hp - H)))
    b_p = jnp.pad(b, ((0, 0), (0, Hp - H)))
    w_fc_p = jnp.pad(w_fc, ((0, Hp - H), (0, Op - O)))
    b_fc_p = jnp.pad(b_fc, ((0, 0), (0, Op - O)))

    out_p = pl.pallas_call(
        rnn_kernel,
        out_shape=jax.ShapeDtypeStruct((Bp, Op), jnp.float32),
        grid_spec=pltpu.PrefetchScalarGridSpec(
            num_scalar_prefetch=0,
            grid=(n_chunks,),
            in_specs=[
                pl.BlockSpec((time_chunk * Bp, Ep), lambda t: (t, 0)),
                pl.BlockSpec((Ep, Hp), lambda t: (0, 0)),
                pl.BlockSpec((Hp, Hp), lambda t: (0, 0)),
                pl.BlockSpec((1, Hp), lambda t: (0, 0)),
                pl.BlockSpec((Hp, Op), lambda t: (0, 0)),
                pl.BlockSpec((1, Op), lambda t: (0, 0)),
            ],
            out_specs=pl.BlockSpec((Bp, Op), lambda t: (0, 0)),
            scratch_shapes=[
                pltpu.VMEM((Bp, Hp), jnp.float32),                    # hidden carry
                pltpu.VMEM((time_chunk * Bp, Hp), jnp.float32),       # x @ W_ih + b
            ],
        ),
        # Time axis is a serial recurrence -> "arbitrary".
        compiler_params=pltpu.CompilerParams(
            dimension_semantics=("arbitrary",)),
    )(emb_flat, w_ih_p, w_hh_p, b_p, w_fc_p, b_fc_p)

    return out_p[:B, :O]


def init_params(key, vocab_size, emb_size, padding_idx, output_size, hidden_size):
    k = jax.random.split(key, 6)
    emb = jax.random.normal(k[0], (vocab_size, emb_size), jnp.float32)
    # padding_idx row is zero (PyTorch nn.Embedding padding_idx semantics)
    emb = emb.at[padding_idx].set(0.0)
    s = 1.0 / jnp.sqrt(hidden_size)
    # Stored pre-transposed so the kernel does x @ W directly.
    w_ih = jax.random.uniform(k[1], (emb_size, hidden_size), jnp.float32, -s, s)
    w_hh = jax.random.uniform(k[2], (hidden_size, hidden_size), jnp.float32, -s, s)
    b_ih = jax.random.uniform(k[3], (1, hidden_size), jnp.float32, -s, s)
    b_hh = jax.random.uniform(k[4], (1, hidden_size), jnp.float32, -s, s)
    w_fc = jax.random.uniform(k[5], (hidden_size, output_size), jnp.float32, -s, s)
    b_fc = jnp.zeros((1, output_size), jnp.float32)
    return {
        "emb": emb,
        "w_ih": w_ih,
        "w_hh": w_hh,
        "b": b_ih + b_hh,   # combined bias, same math as the PyTorch RNN cell
        "w_fc": w_fc,
        "b_fc": b_fc,
    }


def reference_forward(x_tokens, params):
    """Pure-JAX reference for a sanity check."""
    emb = jnp.take(params["emb"], x_tokens, axis=0)    # (B, T, E)
    B, T, E = emb.shape
    H = params["w_hh"].shape[0]
    h = jnp.zeros((B, H), jnp.float32)
    for t in range(T):
        h = jnp.tanh(emb[:, t, :] @ params["w_ih"] + h @ params["w_hh"] + params["b"])
    return h @ params["w_fc"] + params["b_fc"]


if __name__ == "__main__":
    # Small shapes consistent with the module's forward.
    vocab_size, emb_size, padding_idx, output_size, hidden_size = 30, 32, 0, 4, 32
    B, T = 2, 8

    key = jax.random.PRNGKey(0)
    pkey, xkey = jax.random.split(key)
    params = init_params(pkey, vocab_size, emb_size, padding_idx,
                         output_size, hidden_size)
    x = jax.random.randint(xkey, (B, T), 0, vocab_size, dtype=jnp.int32)

    # time_chunk=4 -> grid=(2,): exercises the cross-chunk hidden-state carry
    # (pl.when init / finalize) in addition to the single-chunk fast path.
    out = rnn_forward(x, params, time_chunk=4)
    out = jax.block_until_ready(out)

    ref = reference_forward(x, params)
    assert out.shape == (B, output_size)
    assert jnp.allclose(out, ref, atol=1e-4, rtol=1e-4), (
        f"max abs diff = {jnp.max(jnp.abs(out - ref))}")

    # Also check the auto-chosen chunking path (single chunk at T=8).
    out2 = jax.block_until_ready(rnn_forward(x, params))
    assert jnp.allclose(out2, ref, atol=1e-4, rtol=1e-4)

    print("KERNEL_OK")
</pallas_src>

<mosaic_0001>
module attributes {stable_mosaic.version = 11 : i64} {
  func.func @rnn_kernel(%arg0: i32, %arg1: memref<32x128xf32, #tpu.memory_space<vmem>>, %arg2: memref<128x128xf32, #tpu.memory_space<vmem>>, %arg3: memref<128x128xf32, #tpu.memory_space<vmem>>, %arg4: memref<1x128xf32, #tpu.memory_space<vmem>>, %arg5: memref<128x128xf32, #tpu.memory_space<vmem>>, %arg6: memref<1x128xf32, #tpu.memory_space<vmem>>, %arg7: memref<8x128xf32, #tpu.memory_space<vmem>>, %arg8: memref<8x128xf32, #tpu.memory_space<vmem>>, %arg9: memref<32x128xf32, #tpu.memory_space<vmem>>) attributes {dimension_semantics = [#tpu.dimension_semantics<arbitrary>], iteration_bounds = array<i64: 2>, scalar_prefetch = 0 : i64, scratch_operands = 2 : i64, tpu.core_type = #tpu.core_type<tc>, window_params = [{transform_indices = @transform_0, window_bounds = array<i64: 32, 128>}, {pipeline_mode = #tpu.pipeline_mode<synchronous>, transform_indices = @transform_1, window_bounds = array<i64: 128, 128>}, {pipeline_mode = #tpu.pipeline_mode<synchronous>, transform_indices = @transform_2, window_bounds = array<i64: 128, 128>}, {pipeline_mode = #tpu.pipeline_mode<synchronous>, transform_indices = @transform_3, window_bounds = array<i64: 1, 128>}, {pipeline_mode = #tpu.pipeline_mode<synchronous>, transform_indices = @transform_4, window_bounds = array<i64: 128, 128>}, {pipeline_mode = #tpu.pipeline_mode<synchronous>, transform_indices = @transform_5, window_bounds = array<i64: 1, 128>}, {pipeline_mode = #tpu.pipeline_mode<synchronous>, transform_indices = @transform_6, window_bounds = array<i64: 8, 128>}]} {
    %c0_i32 = arith.constant 0 : i32
    %0 = arith.cmpi eq, %arg0, %c0_i32 : i32
    %1 = arith.extui %0 : i1 to i32
    %c0_i32_0 = arith.constant 0 : i32
    %2 = arith.cmpi ne, %1, %c0_i32_0 : i32
    scf.if %2 {
      %cst_28 = arith.constant 0.000000e+00 : f32
      %44 = vector.broadcast %cst_28 : f32 to vector<8x128xf32>
      %c0_29 = arith.constant 0 : index
      %c0_30 = arith.constant 0 : index
      %45 = vector.load %arg8[%c0_29, %c0_30] : memref<8x128xf32, #tpu.memory_space<vmem>>, vector<8x128xf32>
      tpu.vector_store %arg8[%c0_29, %c0_30], %44 {strides = array<i32>} : memref<8x128xf32, #tpu.memory_space<vmem>>, vector<8x128xf32>,
    } else {
    }
    %c0 = arith.constant 0 : index
    %c0_1 = arith.constant 0 : index
    %3 = vector.load %arg1[%c0, %c0_1] : memref<32x128xf32, #tpu.memory_space<vmem>>, vector<32x128xf32>
    %c0_2 = arith.constant 0 : index
    %c0_3 = arith.constant 0 : index
    %4 = vector.load %arg2[%c0_2, %c0_3] : memref<128x128xf32, #tpu.memory_space<vmem>>, vector<128x128xf32>
    %cst = arith.constant dense<0.000000e+00> : vector<32x128xf32>
    %5 = tpu.matmul %3, %4, %cst {dimension_numbers = #tpu.dot_dimension_numbers<[1], [0], [0], [1], [0, 0, 1, 1], [], []>} : vector<32x128xf32>, vector<128x128xf32>, vector<32x128xf32> -> vector<32x128xf32>
    %c0_4 = arith.constant 0 : index
    %c0_5 = arith.constant 0 : index
    %6 = vector.load %arg4[%c0_4, %c0_5] : memref<1x128xf32, #tpu.memory_space<vmem>>, vector<1x128xf32>
    %7 = vector.broadcast %6 : vector<1x128xf32> to vector<32x128xf32>
    %8 = arith.addf %5, %7 : vector<32x128xf32>
    %c0_6 = arith.constant 0 : index
    %c0_7 = arith.constant 0 : index
    %9 = vector.load %arg9[%c0_6, %c0_7] : memref<32x128xf32, #tpu.memory_space<vmem>>, vector<32x128xf32>
    tpu.vector_store %arg9[%c0_6, %c0_7], %8 {strides = array<i32>} : memref<32x128xf32, #tpu.memory_space<vmem>>, vector<32x128xf32>,
    %c0_8 = arith.constant 0 : index
    %c0_9 = arith.constant 0 : index
    %10 = vector.load %arg3[%c0_8, %c0_9] : memref<128x128xf32, #tpu.memory_space<vmem>>, vector<128x128xf32>
    %c0_10 = arith.constant 0 : index
    %c0_11 = arith.constant 0 : index
    %11 = vector.load %arg8[%c0_10, %c0_11] : memref<8x128xf32, #tpu.memory_space<vmem>>, vector<8x128xf32>
    %c0_i32_12 = arith.constant 0 : i32
    %c8_i32 = arith.constant 8 : i32
    %12 = arith.muli %c0_i32_12, %c8_i32 : i32
    %13 = tpu.assume_multiple %12, 8 : i32
    %14 = arith.index_cast %13 : i32 to index
    %c0_13 = arith.constant 0 : index
    %15 = vector.load %arg9[%14, %c0_13] : memref<32x128xf32, #tpu.memory_space<vmem>>, vector<8x128xf32>
    %cst_14 = arith.constant dense<0.000000e+00> : vector<8x128xf32>
    %16 = tpu.matmul %11, %10, %cst_14 {dimension_numbers = #tpu.dot_dimension_numbers<[1], [0], [0], [1], [0, 0, 1, 1], [], []>} : vector<8x128xf32>, vector<128x128xf32>, vector<8x128xf32> -> vector<8x128xf32>
    %17 = arith.addf %15, %16 : vector<8x128xf32>
    %18 = math.tanh %17 : vector<8x128xf32>
    %c1_i32 = arith.constant 1 : i32
    %c8_i32_15 = arith.constant 8 : i32
    %19 = arith.muli %c1_i32, %c8_i32_15 : i32
    %20 = tpu.assume_multiple %19, 8 : i32
    %21 = arith.index_cast %20 : i32 to index
    %c0_16 = arith.constant 0 : index
    %22 = vector.load %arg9[%21, %c0_16] : memref<32x128xf32, #tpu.memory_space<vmem>>, vector<8x128xf32>
    %cst_17 = arith.constant dense<0.000000e+00> : vector<8x128xf32>
    %23 = tpu.matmul %18, %10, %cst_17 {dimension_numbers = #tpu.dot_dimension_numbers<[1], [0], [0], [1], [0, 0, 1, 1], [], []>} : vector<8x128xf32>, vector<128x128xf32>, vector<8x128xf32> -> vector<8x128xf32>
    %24 = arith.addf %22, %23 : vector<8x128xf32>
    %25 = math.tanh %24 : vector<8x128xf32>
    %c2_i32 = arith.constant 2 : i32
    %c8_i32_18 = arith.constant 8 : i32
    %26 = arith.muli %c2_i32, %c8_i32_18 : i32
    %27 = tpu.assume_multiple %26, 8 : i32
    %28 = arith.index_cast %27 : i32 to index
    %c0_19 = arith.constant 0 : index
    %29 = vector.load %arg9[%28, %c0_19] : memref<32x128xf32, #tpu.memory_space<vmem>>, vector<8x128xf32>
    %cst_20 = arith.constant dense<0.000000e+00> : vector<8x128xf32>
    %30 = tpu.matmul %25, %10, %cst_20 {dimension_numbers = #tpu.dot_dimension_numbers<[1], [0], [0], [1], [0, 0, 1, 1], [], []>} : vector<8x128xf32>, vector<128x128xf32>, vector<8x128xf32> -> vector<8x128xf32>
    %31 = arith.addf %29, %30 : vector<8x128xf32>
    %32 = math.tanh %31 : vector<8x128xf32>
    %c3_i32 = arith.constant 3 : i32
    %c8_i32_21 = arith.constant 8 : i32
    %33 = arith.muli %c3_i32, %c8_i32_21 : i32
    %34 = tpu.assume_multiple %33, 8 : i32
    %35 = arith.index_cast %34 : i32 to index
    %c0_22 = arith.constant 0 : index
    %36 = vector.load %arg9[%35, %c0_22] : memref<32x128xf32, #tpu.memory_space<vmem>>, vector<8x128xf32>
    %cst_23 = arith.constant dense<0.000000e+00> : vector<8x128xf32>
    %37 = tpu.matmul %32, %10, %cst_23 {dimension_numbers = #tpu.dot_dimension_numbers<[1], [0], [0], [1], [0, 0, 1, 1], [], []>} : vector<8x128xf32>, vector<128x128xf32>, vector<8x128xf32> -> vector<8x128xf32>
    %38 = arith.addf %36, %37 : vector<8x128xf32>
    %39 = math.tanh %38 : vector<8x128xf32>
    %c4_i32 = arith.constant 4 : i32
    %c0_24 = arith.constant 0 : index
    %c0_25 = arith.constant 0 : index
    %40 = vector.load %arg8[%c0_24, %c0_25] : memref<8x128xf32, #tpu.memory_space<vmem>>, vector<8x128xf32>
    tpu.vector_store %arg8[%c0_24, %c0_25], %39 {strides = array<i32>} : memref<8x128xf32, #tpu.memory_space<vmem>>, vector<8x128xf32>,
    %c1_i32_26 = arith.constant 1 : i32
    %41 = arith.cmpi eq, %arg0, %c1_i32_26 : i32
    %42 = arith.extui %41 : i1 to i32
    %c0_i32_27 = arith.constant 0 : i32
    %43 = arith.cmpi ne, %42, %c0_i32_27 : i32
    scf.if %43 {
      %c0_28 = arith.constant 0 : index
      %c0_29 = arith.constant 0 : index
      %44 = vector.load %arg5[%c0_28, %c0_29] : memref<128x128xf32, #tpu.memory_space<vmem>>, vector<128x128xf32>
      %cst_30 = arith.constant dense<0.000000e+00> : vector<8x128xf32>
      %45 = tpu.matmul %39, %44, %cst_30 {dimension_numbers = #tpu.dot_dimension_numbers<[1], [0], [0], [1], [0, 0, 1, 1], [], []>} : vector<8x128xf32>, vector<128x128xf32>, vector<8x128xf32> -> vector<8x128xf32>
      %c0_31 = arith.constant 0 : index
      %c0_32 = arith.constant 0 : index
      %46 = vector.load %arg6[%c0_31, %c0_32] : memref<1x128xf32, #tpu.memory_space<vmem>>, vector<1x128xf32>
      %47 = vector.broadcast %46 : vector<1x128xf32> to vector<8x128xf32>
      %48 = arith.addf %45, %47 : vector<8x128xf32>
      %c0_33 = arith.constant 0 : index
      %c0_34 = arith.constant 0 : index
      %49 = vector.load %arg7[%c0_33, %c0_34] : memref<8x128xf32, #tpu.memory_space<vmem>>, vector<8x128xf32>
      tpu.vector_store %arg7[%c0_33, %c0_34], %48 {strides = array<i32>} : memref<8x128xf32, #tpu.memory_space<vmem>>, vector<8x128xf32>,
    } else {
    }
    return
  }
  func.func @transform_0(%arg0: i32) -> (i32, i32) {
    %c0_i32 = arith.constant 0 : i32
    %c0_i32_0 = arith.constant 0 : i32
    return %arg0, %c0_i32 : i32, i32
  }
  func.func @transform_1(%arg0: i32) -> (i32, i32) {
    %c0_i32 = arith.constant 0 : i32
    %c0_i32_0 = arith.constant 0 : i32
    %c0_i32_1 = arith.constant 0 : i32
    return %c0_i32, %c0_i32_0 : i32, i32
  }
  func.func @transform_2(%arg0: i32) -> (i32, i32) {
    %c0_i32 = arith.constant 0 : i32
    %c0_i32_0 = arith.constant 0 : i32
    %c0_i32_1 = arith.constant 0 : i32
    return %c0_i32, %c0_i32_0 : i32, i32
  }
  func.func @transform_3(%arg0: i32) -> (i32, i32) {
    %c0_i32 = arith.constant 0 : i32
    %c0_i32_0 = arith.constant 0 : i32
    %c0_i32_1 = arith.constant 0 : i32
    return %c0_i32, %c0_i32_0 : i32, i32
  }
  func.func @transform_4(%arg0: i32) -> (i32, i32) {
    %c0_i32 = arith.constant 0 : i32
    %c0_i32_0 = arith.constant 0 : i32
    %c0_i32_1 = arith.constant 0 : i32
    return %c0_i32, %c0_i32_0 : i32, i32
  }
  func.func @transform_5(%arg0: i32) -> (i32, i32) {
    %c0_i32 = arith.constant 0 : i32
    %c0_i32_0 = arith.constant 0 : i32
    %c0_i32_1 = arith.constant 0 : i32
    return %c0_i32, %c0_i32_0 : i32, i32
  }
  func.func @transform_6(%arg0: i32) -> (i32, i32) {
    %c0_i32 = arith.constant 0 : i32
    %c0_i32_0 = arith.constant 0 : i32
    %c0_i32_1 = arith.constant 0 : i32
    return %c0_i32, %c0_i32_0 : i32, i32
  }
}

</mosaic_0001>

<bundles_post_ra>
// kernel: tpu_custom_call.1
= control target key start
LH: loop header
LB: loop body
LE: loop exit
PB: predicated region body
PF: predicated region fallthrough
CT: control target
= control target key end

     0   :  { %11 = vsyncpa [#allocation5], 0  ;;  %s1931_s0 = inlined_call_operand.hbm [shape: f32[64,128], index: 0, kind: input, shape index: {}]   ;;  %s1932_s1 = inlined_call_operand.hbm [shape: f32[128,128], index: 1, kind: input, shape index: {}]   ;;  %s1933_s2 = inlined_call_operand.hbm [shape: f32[128,128], index: 2, kind: input, shape index: {}]   ;;  %s1934_s3 = inlined_call_operand.vmem [shape: f32[1,128], index: 3, kind: input, shape index: {}]   ;;  %s1935_s4 = inlined_call_operand.hbm [shape: f32[128,128], index: 4, kind: input, shape index: {}]   ;;  %s1936_s5 = inlined_call_operand.vmem [shape: f32[1,128], index: 5, kind: input, shape index: {}]   ;;  %s1937_s6 = inlined_call_operand.hbm [shape: f32[8,128], index: 6, kind: output, shape index: {}]  }
   0x1   :  { %13 = vsyncpa [#allocation5 + $0x1], 0 }
   0x2   :  { %14 = vsyncpa [#allocation8], 0 }
   0x3   :  { %15 = vsyncpa [#allocation11], 0 }
   0x4   :  { %16 = vsyncpa [#allocation6], 0  ;;  %s1579_s21 = smov 0   ;;  %s1581_s22 = smov 0  }
   0x5   :  { %s1583_s23 = smov 0   ;;  %s1585_s24 = smov 0  }
   0x6 LB: > { %s1598_s25 = sadd.s32 4294967295, %s1530_s24   ;;  %p42_p0 = scmp.ne.s32.totalorder %s1522_s22, %s1518_s21  ;;  %s1530_s24 = sphi %s1585_s24, %s1955_s24   ;;  %s1526_s23 = sphi %s1583_s23, %s1954_s23   ;;  %s1522_s22 = sphi %s1581_s22, %s1953_s22   ;;  %s1518_s21 = sphi %s1579_s21, %s1952_s21  }
   0x7   : > { %p1938_p1 = scmp.eq.s32.totalorder %s1598_s25, 0  ;;  %p922_p2 = scmp.ge.s32.totalorder %s1530_s24, 1 }
   0x8   : > { %p179_p3 = scmp.lt.s32.totalorder %s1530_s24, 3  ;;  %s1532_s28 = smov [#allocation7]  }
   0x9   : > { %p1607_p5 = por %p1938_p1, %p42_p0  ;;  %s191_s29 = sshll.u32 %s1532_s28, 4  ;;  %s192_s29 = int_to_ptr.vmem [resolvable:$true] %s191_s29 }
   0xa   : > { %p1611_p6 = pnand %p922_p2, %p179_p3  ;;  %s1533_s7 = smov [#allocation9]  }
   0xb   : > { %s1941_s26 = scalar_select %p1607_p5, 1, 0 }
   0xc   : > { %s1942_s27 = scalar_select %p1611_p6, 1, 0 }
   0xd   : > { %p1280_p7 = pneg %p1611_p6  ;;  %s204_s8 = sshll.u32 %s1533_s7, 4  ;;  %s205_s8 = int_to_ptr.vmem [resolvable:$true] %s204_s8 }
   0xe   : > { %s1534_s9 = smov [#allocation10]   ;;  %s1365_s11 = scalar_lea.vmem %s192_s29, 2048 }
   0xf   : > { %p1619_p8 = pnand %p1280_p7, %p1938_p1  ;;  %s220_s10 = sshll.u32 %s1534_s9, 4  ;;  %s221_s10 = int_to_ptr.vmem [resolvable:$true] %s220_s10 }
  0x10   : > { %p1366_p10 = scmp.ne.s32.totalorder %s192_s29, %s1365_s11  ;;  %p1373_p13 = scmp.lt.s32.totalorder %s192_s29, %s192_s29 }
  0x11   : > { %p1356_p9 = pneg %p1619_p8  ;;  %p1374_p0 = scmp.lt.s32.totalorder %s1365_s11, %s1365_s11 }
  0x13   : > { %p1368_p11 = pnand %p1366_p10, %p1356_p9  ;;  %p1375_p2 = por %p1374_p0, %p1373_p13 }
  0x15   : > { %p1369_p12 = pneg %p1368_p11 }
  0x17   : > { %p1376_p3 = pnand %p1375_p2, %p1369_p12 }
  0x19   : > { %1379 = shalt.err (!%p1376_p3)
}
  0x1a   : > { %s1535_s12 = smov 128   ;;  %s1536_s13 = smov 8  }
  0x1b   : > { %1283 = dma.hbm_to_vmem [thread:$0]  (!%p1619_p8), %s1932_s1, 2048, %s192_s29, [#allocation8], %s1535_s12, %s1535_s12, %s1536_s13  }
  0x1c   : > { %s1391_s16 = scalar_lea.vmem %s205_s8, 2048  ;;  %p1399_p12 = scmp.lt.s32.totalorder %s205_s8, %s205_s8 }
  0x1d   : > { %p1392_p7 = scmp.ne.s32.totalorder %s205_s8, %s1391_s16  ;;  %p1400_p13 = scmp.lt.s32.totalorder %s1391_s16, %s1391_s16 }
  0x1f   : > { %p1394_p10 = pnand %p1392_p7, %p1356_p9  ;;  %p1401_p0 = por %p1400_p13, %p1399_p12 }
  0x21   : > { %p1395_p11 = pneg %p1394_p10 }
  0x23   : > { %p1402_p2 = pnand %p1401_p0, %p1395_p11 }
  0x25   : > { %1405 = shalt.err (!%p1402_p2)
}
  0x26   : > { %1286 = dma.hbm_to_vmem [thread:$0]  (!%p1619_p8), %s1933_s2, 2048, %s205_s8, [#allocation8], %s1535_s12, %s1535_s12, %s1536_s13  }
  0x27   : > { %s1417_s19 = scalar_lea.vmem %s221_s10, 2048  ;;  %p1425_p12 = scmp.lt.s32.totalorder %s221_s10, %s221_s10 }
  0x28   : > { %p1418_p3 = scmp.ne.s32.totalorder %s221_s10, %s1417_s19  ;;  %p1426_p11 = scmp.lt.s32.totalorder %s1417_s19, %s1417_s19 }
  0x2a   : > { %p1420_p7 = pnand %p1418_p3, %p1356_p9  ;;  %p1427_p13 = por %p1426_p11, %p1425_p12 }
  0x2c   : > { %p1421_p10 = pneg %p1420_p7 }
  0x2e   : > { %p1428_p0 = pnand %p1427_p13, %p1421_p10 }
  0x30   : > { %1431 = shalt.err (!%p1428_p0)
}
  0x31   : > { %1289 = dma.hbm_to_vmem [thread:$0]  (!%p1619_p8), %s1935_s4, 2048, %s221_s10, [#allocation11], %s1535_s12, %s1535_s12, %s1536_s13  }
  0x32   : > { %s1659_s28 = sadd.s32 1, %s1530_s24   ;;  %s29_s30 = sadd.s32 1, %s1526_s23 }
  0x33   : > { %s26_s29 = ssub.s32 %s1530_s24, %s1659_s28  ;;  %p36_p2 = scmp.ne.s32.totalorder %s1526_s23, %s1522_s22 }
  0x34   : > { %p27_p9 = scmp.eq.s32.totalorder %s26_s29, 0  ;;  %p37_p3 = scmp.eq.s32.totalorder %s1530_s24, 0 }
  0x35   : > { %p1297_p7 = scmp.lt.s32.totalorder %s1530_s24, 2  ;;  %s237_s8 = sand.u32 1, %s1526_s23  }
  0x36   : > { %s1669_s7 = scalar_select %p27_p9, %s1526_s23, %s29_s30  }
  0x37   : > { %p38_p10 = por %p37_p3, %p36_p2  ;;  %s927_s9 = sshll.u32 %s237_s8, 5 }
  0x38   : > { %s943_s11 = sshll.u32 %s1530_s24, 9  ;;  %s241_s10 = scalar_lea.vmem [#allocation4], %s927_s9 }
  0x39   : > { %s1676_s16 = scalar_lea.hbm %s1931_s0, %s943_s11  ;;  %s248_s17 = sshll.u32 %s241_s10, 4  ;;  %s1678_s17 = int_to_ptr.vmem [resolvable:$true] %s248_s17 }
  0x3a   : > { %p1680_p8 = pnand %p1297_p7, %p38_p10  ;;  %s1684_s19 = scalar_lea.sflag [#allocation5], %s237_s8 }
  0x3b   : > { %s1432_s24 = scalar_lea.hbm %s1676_s16, 512  ;;  %s1437_s29 = scalar_lea.hbm %s1931_s0, 1024 }
  0x3c   : > { %p1433_p12 = scmp.ne.s32.totalorder %s1676_s16, %s1432_s24  ;;  %p1434_p11 = pneg %p1680_p8 }
  0x3d   : > { %p1438_p9 = scmp.lt.s32.totalorder %s1676_s16, %s1931_s0  ;;  %p1439_p2 = scmp.lt.s32.totalorder %s1437_s29, %s1432_s24 }
  0x3e   : > { %p1435_p13 = pnand %p1434_p11, %p1433_p12 }
  0x3f   : > { %p1440_p3 = por %p1439_p2, %p1438_p9 }
  0x40   : > { %p1436_p0 = pneg %p1435_p13 }
  0x42   : > { %p1441_p7 = pnand %p1440_p3, %p1436_p0 }
  0x44   : > { %1444 = shalt.err (!%p1441_p7)
}
  0x45   : > { %s1445_s8 = scalar_lea.vmem %s1678_s17, 512  ;;  %s1537_s11 = smov [#allocation4]  }
  0x46   : > { %p1446_p10 = scmp.ne.s32.totalorder %s1678_s17, %s1445_s8  ;;  %s1450_s14 = sshll.u32 %s1537_s11, 4  ;;  %s1451_s14 = int_to_ptr.vmem [resolvable:$false] %s1450_s14 }
  0x47   : > { %s1452_s15 = scalar_lea.vmem %s1451_s14, 1024  ;;  %p1453_p13 = scmp.lt.s32.totalorder %s1678_s17, %s1451_s14 }
  0x48   : > { %p1448_p4 = pnand %p1446_p10, %p1434_p11  ;;  %p1454_p1 = scmp.lt.s32.totalorder %s1452_s15, %s1445_s8 }
  0x4a   : > { %p1449_p12 = pneg %p1448_p4  ;;  %p1455_p5 = por %p1454_p1, %p1453_p13 }
  0x4c   : > { %p1456_p6 = pnand %p1455_p5, %p1449_p12 }
  0x4e   : > { %1459 = shalt.err (!%p1456_p6)
}
  0x4f   : > { %1293 = dma.hbm_to_vmem [thread:$0]  (!%p1680_p8), %s1676_s16, 512, %s1678_s17, %s1684_s19, %s1535_s12, %s1535_s12, %s1536_s13  }
  0x50   : > { %p1945_p4 = scmp.ne.s32.totalorder %s1942_s27, 0 }
  0x51   : > { %s262_s10 = sand.u32 (!%p1945_p4), 1, %s1522_s22   ;;  %p1946_p1 = scmp.ne.s32.totalorder (!%p1945_p4), %s1941_s26, 0 }
  0x52   : > { %260 = sbr.rel (%p1945_p4) target bundleno = 1221 (0x4c5), region = 44  ;;  %s931_s24 = sshll.u32 (!%p1945_p4), %s262_s10, 5 }
  0x53   : > { %s263_s20 = scalar_lea.sflag (!%p1945_p4), [#allocation5], %s262_s10  ;;  %s1711_s21 = scalar_lea.vmem (!%p1945_p4), [#allocation4], %s931_s24 }
  0x57   : > { %1501 = dma.done.wait (%p1946_p1), %s263_s20, 512  }
  0x58   : > { %1503 = vsyncadd (%p1946_p1), %s263_s20, 4294966784  ;;  %p1947_p5 = scmp.eq.s32.totalorder %s1598_s25, 0 }
  0x5a   : > { %1505 = dma.done.wait (%p1947_p5), [#allocation8], 4096   ;;  %p1948_p6 = pmov %p1947_p5 }
  0x5b   : > { %p1949_p8 = pmov %p1947_p5 }
  0x5c   : > { %1507 = vsyncadd (%p1948_p6), [#allocation8], 4294963200 }
  0x5d   : > { %1509 = dma.done.wait (%p1949_p8), [#allocation11], 2048   ;;  %p1950_p11 = pmov %p1947_p5 }
  0x5e   : > { %p1951_p0 = scmp.ne.s32.totalorder %s1598_s25, 0 }
  0x5f   : > { %1511 = vsyncadd (%p1950_p11), [#allocation11], 4294965248 }
  0x60   : > { %306 = sbr.rel (%p1951_p0) target bundleno = 103 (0x67), region = 64 }
  0x65   : > { %v1538_v0 = vmov 0.0  }
  0x66   : > { %307 = vst [vmem:[#allocation2] sm:$0xff] %v1538_v0 }
  0x67 PF: > { %v327_v1 = vld [vmem:[#allocation7 + $0x78] sm:$0xff]  ;;  %v326_v2 = vld [vmem:[#allocation7 + $0x70] sm:$0xff]  ;;  %v1539_v4 = vmov 0.0   ;;  %v325_v6 = vld [vmem:[#allocation7 + $0x68] sm:$0xff]  ;;  %vm1540_vm0 = vmmov 0   ;;  %p937_p9 = scmp.ne.s32.totalorder %s1598_s25, 1 }
  0x68   : > { %v1727_v3 = vld [vmem:[#allocation9 + $0x78] sm:$0xff]  ;;  %1049 = vmatprep.subr.mxu0 %v327_v1  ;;  %1087 = vmatprep.subr.mxu1 %v1539_v4  ;;  %v1730_v5 = vld [vmem:[#allocation9 + $0x70] sm:$0xff]  ;;  %v1734_v7 = vld [vmem:[#allocation9 + $0x68] sm:$0xff] }
  0x69   : > { %1050 = vmatpush3.msra.mxu0 %v327_v1  ;;  %1088 = vmatpush3.msra.mxu1 %v1727_v3  ;;  %v324_v8 = vld [vmem:[#allocation7 + $0x60] sm:$0xff]  ;;  %v323_v10 = vld [vmem:[#allocation7 + $0x58] sm:$0xff]  ;;  %v322_v12 = vld [vmem:[#allocation7 + $0x50] sm:$0xff] }
  0x6a   : > { %1051 = vmatprep.subr.mxu0 %v326_v2  ;;  %1089 = vmatprep.subr.mxu1 %v1539_v4  ;;  %v1738_v9 = vld [vmem:[#allocation9 + $0x60] sm:$0xff]  ;;  %v1742_v11 = vld [vmem:[#allocation9 + $0x58] sm:$0xff]  ;;  %v1746_v13 = vld [vmem:[#allocation9 + $0x50] sm:$0xff] }
  0x6b   : > { %1052 = vmatpush3.msra.mxu0 %v326_v2  ;;  %1090 = vmatpush3.msra.mxu1 %v1730_v5  ;;  %v321_v14 = vld [vmem:[#allocation7 + $0x48] sm:$0xff]  ;;  %v320_v16 = vld [vmem:[#allocation7 + $0x40] sm:$0xff]  ;;  %v319_v18 = vld [vmem:[#allocation7 + $0x38] sm:$0xff] }
  0x6c   : > { %1053 = vmatprep.subr.mxu0 %v325_v6  ;;  %1091 = vmatprep.subr.mxu1 %v1539_v4  ;;  %v1750_v15 = vld [vmem:[#allocation9 + $0x48] sm:$0xff]  ;;  %v1754_v17 = vld [vmem:[#allocation9 + $0x40] sm:$0xff]  ;;  %v1758_v19 = vld [vmem:[#allocation9 + $0x38] sm:$0xff] }
  0x6d   : > { %1054 = vmatpush3.msra.mxu0 %v325_v6  ;;  %1092 = vmatpush3.msra.mxu1 %v1734_v7  ;;  %v318_v20 = vld [vmem:[#allocation7 + $0x30] sm:$0xff]  ;;  %v317_v22 = vld [vmem:[#allocation7 + $0x28] sm:$0xff]  ;;  %v316_v24 = vld [vmem:[#allocation7 + $0x20] sm:$0xff] }
  0x6e   : > { %1055 = vmatprep.subr.mxu0 %v324_v8  ;;  %1093 = vmatprep.subr.mxu1 %v1539_v4  ;;  %v1762_v21 = vld [vmem:[#allocation9 + $0x30] sm:$0xff]  ;;  %v1766_v23 = vld [vmem:[#allocation9 + $0x28] sm:$0xff]  ;;  %v1770_v25 = vld [vmem:[#allocation9 + $0x20] sm:$0xff] }
  0x6f   : > { %1056 = vmatpush3.msra.mxu0 %v324_v8  ;;  %1094 = vmatpush3.msra.mxu1 %v1738_v9  ;;  %v315_v26 = vld [vmem:[#allocation7 + $0x18] sm:$0xff]  ;;  %v314_v28 = vld [vmem:[#allocation7 + $0x10] sm:$0xff]  ;;  %v313_v30 = vld [vmem:[#allocation7 + $0x8] sm:$0xff] }
  0x70   : > { %1057 = vmatprep.subr.mxu0 %v323_v10  ;;  %1095 = vmatprep.subr.mxu1 %v1539_v4  ;;  %v1774_v27 = vld [vmem:[#allocation9 + $0x18] sm:$0xff]  ;;  %v1778_v29 = vld [vmem:[#allocation9 + $0x10] sm:$0xff]  ;;  %v308_v31 = vld [vmem:[%s1711_s21] sm:$0xff] }
  0x71   : > { %1058 = vmatpush3.msra.mxu0 %v323_v10  ;;  %1096 = vmatpush3.msra.mxu1 %v1742_v11  ;;  %v312_v32 = vld [vmem:[#allocation7] sm:$0xff]  ;;  %v1784_v33 = vld [vmem:[#allocation9 + $0x8] sm:$0xff]  ;;  %v440_v36 = vld [vmem:[#allocation2] sm:$0xff] }
  0x72   : > { %1059 = vmatprep.subr.mxu0 %v322_v12  ;;  %1097 = vmatprep.subr.mxu1 %v1539_v4  ;;  %v309_v34 = vld [vmem:[%s1711_s21 + $0x8] sm:$0xff]  ;;  %v1788_v35 = vld [vmem:[#allocation9] sm:$0xff]  ;;  %v310_v37 = vld [vmem:[%s1711_s21 + $0x10] sm:$0xff] }
  0x73   : > { %1060 = vmatpush3.msra.mxu0 %v322_v12  ;;  %1098 = vmatpush3.msra.mxu1 %v1746_v13  ;;  %v311_v38 = vld [vmem:[%s1711_s21 + $0x18] sm:$0xff] }
  0x74   : > { %1061 = vmatprep.subr.mxu0 %v321_v14  ;;  %1099 = vmatprep.subr.mxu1 %v1539_v4  ;;  %v936_v40 = vld [vmem:[%s1934_s3] ss:$0 sm:$0xff] }
  0x75   : > { %1062 = vmatpush3.msra.mxu0 %v321_v14  ;;  %1100 = vmatpush3.msra.mxu1 %v1750_v15 }
  0x76   : > { %1063 = vmatprep.subr.mxu0 %v320_v16  ;;  %1101 = vmatprep.subr.mxu1 %v1539_v4 }
  0x77   : > { %1064 = vmatpush3.msra.mxu0 %v320_v16  ;;  %1102 = vmatpush3.msra.mxu1 %v1754_v17 }
  0x78   : > { %1065 = vmatprep.subr.mxu0 %v319_v18  ;;  %1103 = vmatprep.subr.mxu1 %v1539_v4 }
  0x79   : > { %1066 = vmatpush3.msra.mxu0 %v319_v18  ;;  %1104 = vmatpush3.msra.mxu1 %v1758_v19 }
  0x7a   : > { %1067 = vmatprep.subr.mxu0 %v318_v20  ;;  %1105 = vmatprep.subr.mxu1 %v1539_v4 }
  0x7b   : > { %1068 = vmatpush3.msra.mxu0 %v318_v20  ;;  %1106 = vmatpush3.msra.mxu1 %v1762_v21 }
  0x7c   : > { %1069 = vmatprep.subr.mxu0 %v317_v22  ;;  %1107 = vmatprep.subr.mxu1 %v1539_v4 }
  0x7d   : > { %1070 = vmatpush3.msra.mxu0 %v317_v22  ;;  %1108 = vmatpush3.msra.mxu1 %v1766_v23 }
  0x7e   : > { %1071 = vmatprep.subr.mxu0 %v316_v24  ;;  %1109 = vmatprep.subr.mxu1 %v1539_v4 }
  0x7f   : > { %1072 = vmatpush3.msra.mxu0 %v316_v24  ;;  %1110 = vmatpush3.msra.mxu1 %v1770_v25 }
  0x80   : > { %1073 = vmatprep.subr.mxu0 %v315_v26  ;;  %1111 = vmatprep.subr.mxu1 %v1539_v4 }
  0x81   : > { %1074 = vmatpush3.msra.mxu0 %v315_v26  ;;  %1112 = vmatpush3.msra.mxu1 %v1774_v27 }
  0x82   : > { %1075 = vmatprep.subr.mxu0 %v314_v28  ;;  %1113 = vmatprep.subr.mxu1 %v1539_v4 }
  0x83   : > { %1076 = vmatpush3.msra.mxu0 %v314_v28  ;;  %1114 = vmatpush3.msra.mxu1 %v1778_v29 }
  0x84   : > { %1077 = vmatprep.subr.mxu0 %v313_v30  ;;  %1115 = vmatprep.subr.mxu1 %v1539_v4 }
  0x85   : > { %1078 = vmatpush3.msra.mxu0 %v313_v30  ;;  %1081 = vmatprep.mubr.f32.mxu0 %v308_v31 }
  0x86   : > { %1079 = vmatprep.subr.mxu0 %v312_v32  ;;  %1116 = vmatpush3.msra.mxu1 %v1784_v33 }
  0x87   : > { %1080 = vmatpush3.msra.mxu0 %v312_v32  ;;  %1117 = vmatprep.subr.mxu1 %v1539_v4 }
  0x88   : > { %1082 = vmatmul.mubr.f32.vlgmr.msra.gmra.mxu0 %v309_v34  ;;  %1118 = vmatpush3.msra.mxu1 %v1788_v35 }
  0x89   : > { %1119 = vmatprep.mubr.msk.f32.mxu1 %vm1540_vm0, %v1539_v4  ;;  %1122 = vmatprep.subr.mxu0 %v1539_v4 }
  0x8a   : > { %1120 = vmatmul.mubr.f32.vlgmr.msra.gmra.mxu1 %v440_v36  ;;  %1123 = vmatpush3.msra.mxu0 %v1727_v3 }
  0x8b   : > { %1124 = vmatprep.subr.mxu0 %v1539_v4  ;;  %1157 = vmatprep.subr.mxu1 %v1539_v4 }
  0x8c   : > { %1125 = vmatpush3.msra.mxu0 %v1730_v5  ;;  %1158 = vmatpush3.msra.mxu1 %v1727_v3 }
  0x8d   : > { %1126 = vmatprep.subr.mxu0 %v1539_v4  ;;  %1159 = vmatprep.subr.mxu1 %v1539_v4 }
  0x8e   : > { %1127 = vmatpush3.msra.mxu0 %v1734_v7  ;;  %1160 = vmatpush3.msra.mxu1 %v1730_v5 }
  0x8f   : > { %1128 = vmatprep.subr.mxu0 %v1539_v4  ;;  %1161 = vmatprep.subr.mxu1 %v1539_v4 }
  0x90   : > { %1129 = vmatpush3.msra.mxu0 %v1738_v9  ;;  %1162 = vmatpush3.msra.mxu1 %v1734_v7 }
  0x91   : > { %1130 = vmatprep.subr.mxu0 %v1539_v4  ;;  %1163 = vmatprep.subr.mxu1 %v1539_v4 }
  0x92   : > { %1131 = vmatpush3.msra.mxu0 %v1742_v11  ;;  %1164 = vmatpush3.msra.mxu1 %v1738_v9 }
  0x93   : > { %1132 = vmatprep.subr.mxu0 %v1539_v4  ;;  %1165 = vmatprep.subr.mxu1 %v1539_v4 }
  0x94   : > { %1133 = vmatpush3.msra.mxu0 %v1746_v13  ;;  %1166 = vmatpush3.msra.mxu1 %v1742_v11 }
  0x95   : > { %1134 = vmatprep.subr.mxu0 %v1539_v4  ;;  %1167 = vmatprep.subr.mxu1 %v1539_v4 }
  0x96   : > { %1135 = vmatpush3.msra.mxu0 %v1750_v15  ;;  %1168 = vmatpush3.msra.mxu1 %v1746_v13 }
  0x97   : > { %1136 = vmatprep.subr.mxu0 %v1539_v4  ;;  %1169 = vmatprep.subr.mxu1 %v1539_v4 }
  0x98   : > { %1137 = vmatpush3.msra.mxu0 %v1754_v17  ;;  %1170 = vmatpush3.msra.mxu1 %v1750_v15 }
  0x99   : > { %1138 = vmatprep.subr.mxu0 %v1539_v4  ;;  %1171 = vmatprep.subr.mxu1 %v1539_v4 }
  0x9a   : > { %1139 = vmatpush3.msra.mxu0 %v1758_v19  ;;  %1172 = vmatpush3.msra.mxu1 %v1754_v17 }
  0x9b   : > { %1140 = vmatprep.subr.mxu0 %v1539_v4  ;;  %1173 = vmatprep.subr.mxu1 %v1539_v4 }
  0x9c   : > { %1141 = vmatpush3.msra.mxu0 %v1762_v21  ;;  %1174 = vmatpush3.msra.mxu1 %v1758_v19 }
  0x9d   : > { %1142 = vmatprep.subr.mxu0 %v1539_v4  ;;  %1175 = vmatprep.subr.mxu1 %v1539_v4 }
  0x9e   : > { %1143 = vmatpush3.msra.mxu0 %v1766_v23  ;;  %1176 = vmatpush3.msra.mxu1 %v1762_v21 }
  0x9f   : > { %1144 = vmatprep.subr.mxu0 %v1539_v4  ;;  %1177 = vmatprep.subr.mxu1 %v1539_v4 }
  0xa0   : > { %1145 = vmatpush3.msra.mxu0 %v1770_v25  ;;  %1178 = vmatpush3.msra.mxu1 %v1766_v23 }
  0xa1   : > { %1146 = vmatprep.subr.mxu0 %v1539_v4  ;;  %1179 = vmatprep.subr.mxu1 %v1539_v4 }
  0xa2   : > { %1147 = vmatpush3.msra.mxu0 %v1774_v27  ;;  %1180 = vmatpush3.msra.mxu1 %v1770_v25 }
  0xa3   : > { %1148 = vmatprep.subr.mxu0 %v1539_v4  ;;  %1181 = vmatprep.subr.mxu1 %v1539_v4 }
  0xa4   : > { %1149 = vmatpush3.msra.mxu0 %v1778_v29  ;;  %1182 = vmatpush3.msra.mxu1 %v1774_v27 }
  0xa5   : > { %1150 = vmatprep.subr.mxu0 %v1539_v4  ;;  %1183 = vmatprep.subr.mxu1 %v1539_v4 }
  0xa6   : > { %1151 = vmatpush3.msra.mxu0 %v1784_v33  ;;  %1184 = vmatpush3.msra.mxu1 %v1778_v29 }
  0xa7   : > { %1152 = vmatprep.subr.mxu0 %v1539_v4  ;;  %1185 = vmatprep.subr.mxu1 %v1539_v4 }
  0xa8   : > { %1153 = vmatpush3.msra.mxu0 %v1788_v35  ;;  %1186 = vmatpush3.msra.mxu1 %v1784_v33 }
  0xa9   : > { %1187 = vmatprep.subr.mxu1 %v1539_v4  ;;  %1189 = vmatprep.mubr.msk.f32.mxu1 %vm1540_vm0, %v1539_v4 }
  0xaa   : > { %1188 = vmatpush3.msra.mxu1 %v1788_v35  ;;  %1192 = vmatprep.subr.mxu0 %v1539_v4 }
  0xab   : > { %1084 = vmatprep.mubr.f32.mxu0 %v310_v37 }
  0xac   : > { %1085 = vmatmul.mubr.f32.gmra.mxu0 %v311_v38 }
  0xad   : > { %1154 = vmatprep.mubr.msk.f32.mxu0 %vm1540_vm0, %v1539_v4 }
 0x148   : > { %v1083_v39 = vpop.f32.mrf.mxu0 }
 0x149   : > { %v407_v49 = vadd.f32 %v1083_v39, %v936_v40 }
 0x14a   : > { %v401_v41 = vpop.f32.mrf.mxu0  ;;  %v508_v42 = vpop.f32.mrf.mxu1 }
 0x14b   : > { %v402_v43 = vadd.f32 %v936_v40, %v401_v41 }
 0x14c   : > { %v1121_v44 = vpop.f32.mrf.mxu1 }
 0x14d   : > { %v512_v45 = vadd.f32 %v508_v42, %v402_v43 }
 0x14f   : > { %1346 = vtanh.f32 %v512_v45 }
 0x15c   : > { %v1347_v46 = vpop.eup %1346 }
 0x15d   : > { %1155 = vmatmul.mubr.f32.vlgmr.msra.gmra.mxu0 %v1347_v46 }
 0x15e   : > { %1193 = vmatpush3.msra.mxu0 %v1727_v3  ;;  %1224 = vmatprep.mubr.msk.f32.mxu0 %vm1540_vm0, %v1539_v4 }
 0x15f   : > { %1194 = vmatprep.subr.mxu0 %v1539_v4 }
 0x160   : > { %1195 = vmatpush3.msra.mxu0 %v1730_v5 }
 0x161   : > { %1196 = vmatprep.subr.mxu0 %v1539_v4 }
 0x162   : > { %1197 = vmatpush3.msra.mxu0 %v1734_v7 }
 0x163   : > { %1198 = vmatprep.subr.mxu0 %v1539_v4 }
 0x164   : > { %1199 = vmatpush3.msra.mxu0 %v1738_v9 }
 0x165   : > { %1200 = vmatprep.subr.mxu0 %v1539_v4 }
 0x166   : > { %1201 = vmatpush3.msra.mxu0 %v1742_v11 }
 0x167   : > { %1202 = vmatprep.subr.mxu0 %v1539_v4 }
 0x168   : > { %1203 = vmatpush3.msra.mxu0 %v1746_v13 }
 0x169   : > { %1204 = vmatprep.subr.mxu0 %v1539_v4 }
 0x16a   : > { %1205 = vmatpush3.msra.mxu0 %v1750_v15 }
 0x16b   : > { %1206 = vmatprep.subr.mxu0 %v1539_v4 }
 0x16c   : > { %1207 = vmatpush3.msra.mxu0 %v1754_v17  ;;  %v1086_v47 = vpop.f32.mrf.mxu0 }
 0x16d   : > { %1208 = vmatprep.subr.mxu0 %v1539_v4  ;;  %v417_v59 = vadd.f32 %v1086_v47, %v936_v40 }
 0x16e   : > { %1209 = vmatpush3.msra.mxu0 %v1758_v19  ;;  %v411_v48 = vpop.f32.mrf.mxu0 }
 0x16f   : > { %1210 = vmatprep.subr.mxu0 %v1539_v4  ;;  %v412_v54 = vadd.f32 %v936_v40, %v411_v48 }
 0x170   : > { %1211 = vmatpush3.msra.mxu0 %v1762_v21 }
 0x171   : > { %1212 = vmatprep.subr.mxu0 %v1539_v4 }
 0x172   : > { %1213 = vmatpush3.msra.mxu0 %v1766_v23 }
 0x173   : > { %1214 = vmatprep.subr.mxu0 %v1539_v4 }
 0x174   : > { %1215 = vmatpush3.msra.mxu0 %v1770_v25 }
 0x175   : > { %1216 = vmatprep.subr.mxu0 %v1539_v4 }
 0x176   : > { %1217 = vmatpush3.msra.mxu0 %v1774_v27 }
 0x177   : > { %1218 = vmatprep.subr.mxu0 %v1539_v4 }
 0x178   : > { %1219 = vmatpush3.msra.mxu0 %v1778_v29 }
 0x179   : > { %1220 = vmatprep.subr.mxu0 %v1539_v4 }
 0x17a   : > { %1221 = vmatpush3.msra.mxu0 %v1784_v33 }
 0x17b   : > { %1222 = vmatprep.subr.mxu0 %v1539_v4 }
 0x17c   : > { %1223 = vmatpush3.msra.mxu0 %v1788_v35 }
 0x21d   : > { %v582_v50 = vpop.f32.mrf.mxu0 }
 0x21e   : > { %v586_v51 = vadd.f32 %v582_v50, %v407_v49 }
 0x21f   : > { %v1156_v52 = vpop.f32.mrf.mxu0 }
 0x220   : > { %1348 = vtanh.f32 %v586_v51 }
 0x22d   : > { %v1349_v53 = vpop.eup %1348 }
 0x22e   : > { %1190 = vmatmul.mubr.f32.vlgmr.msra.gmra.mxu1 %v1349_v53 }
 0x2ee   : > { %v656_v55 = vpop.f32.mrf.mxu1 }
 0x2ef   : > { %v660_v56 = vadd.f32 %v656_v55, %v412_v54 }
 0x2f0   : > { %v1191_v57 = vpop.f32.mrf.mxu1 }
 0x2f1   : > { %1350 = vtanh.f32 %v660_v56 }
 0x2fe   : > { %v1351_v58 = vpop.eup %1350 }
 0x2ff   : > { %1225 = vmatmul.mubr.f32.vlgmr.msra.gmra.mxu0 %v1351_v58 }
 0x3bf   : > { %v730_v60 = vpop.f32.mrf.mxu0 }
 0x3c0   : > { %v734_v61 = vadd.f32 %v730_v60, %v417_v59 }
 0x3c1   : > { %v1226_v62 = vpop.f32.mrf.mxu0 }
 0x3c2   : > { %1352 = vtanh.f32 %v734_v61 }
 0x3cc   : > { %740 = sbr.rel (%p937_p9) target bundleno = 1206 (0x4b6), region = 68 }
 0x3cf   : > { %v1353_v63 = vpop.eup %1352 }
 0x3d0   : > { %736 = vst [vmem:[#allocation2] sm:$0xff] %v1353_v63 }
 0x3d1   : > { %v756_v0 = vld [vmem:[#allocation10 + $0x78] sm:$0xff]  ;;  %v1541_v1 = vmov 0.0   ;;  %v755_v2 = vld [vmem:[#allocation10 + $0x70] sm:$0xff]  ;;  %vm1542_vm1 = vmmov 0   ;;  %v754_v3 = vld [vmem:[#allocation10 + $0x68] sm:$0xff] }
 0x3d2   : > { %1227 = vmatprep.subr.mxu0 %v1541_v1  ;;  %1259 = vmatprep.mubr.msk.f32.mxu0 %vm1542_vm1, %v1541_v1  ;;  %v753_v4 = vld [vmem:[#allocation10 + $0x60] sm:$0xff]  ;;  %v752_v5 = vld [vmem:[#allocation10 + $0x58] sm:$0xff]  ;;  %v751_v6 = vld [vmem:[#allocation10 + $0x50] sm:$0xff] }
 0x3d3   : > { %1228 = vmatpush3.msra.mxu0 %v756_v0  ;;  %v750_v7 = vld [vmem:[#allocation10 + $0x48] sm:$0xff]  ;;  %v749_v8 = vld [vmem:[#allocation10 + $0x40] sm:$0xff]  ;;  %v748_v9 = vld [vmem:[#allocation10 + $0x38] sm:$0xff] }
 0x3d4   : > { %1229 = vmatprep.subr.mxu0 %v1541_v1  ;;  %v747_v10 = vld [vmem:[#allocation10 + $0x30] sm:$0xff]  ;;  %v746_v11 = vld [vmem:[#allocation10 + $0x28] sm:$0xff]  ;;  %v745_v12 = vld [vmem:[#allocation10 + $0x20] sm:$0xff] }
 0x3d5   : > { %1230 = vmatpush3.msra.mxu0 %v755_v2  ;;  %v744_v13 = vld [vmem:[#allocation10 + $0x18] sm:$0xff]  ;;  %v743_v14 = vld [vmem:[#allocation10 + $0x10] sm:$0xff]  ;;  %v742_v15 = vld [vmem:[#allocation10 + $0x8] sm:$0xff] }
 0x3d6   : > { %1231 = vmatprep.subr.mxu0 %v1541_v1  ;;  %v741_v16 = vld [vmem:[#allocation10] sm:$0xff]  ;;  %v938_v17 = vld [vmem:[%s1936_s5] ss:$0 sm:$0xff] }
 0x3d7   : > { %1232 = vmatpush3.msra.mxu0 %v754_v3 }
 0x3d8   : > { %1233 = vmatprep.subr.mxu0 %v1541_v1 }
 0x3d9   : > { %1234 = vmatpush3.msra.mxu0 %v753_v4 }
 0x3da   : > { %1235 = vmatprep.subr.mxu0 %v1541_v1 }
 0x3db   : > { %1236 = vmatpush3.msra.mxu0 %v752_v5 }
 0x3dc   : > { %1237 = vmatprep.subr.mxu0 %v1541_v1 }
 0x3dd   : > { %1238 = vmatpush3.msra.mxu0 %v751_v6 }
 0x3de   : > { %1239 = vmatprep.subr.mxu0 %v1541_v1 }
 0x3df   : > { %1240 = vmatpush3.msra.mxu0 %v750_v7 }
 0x3e0   : > { %1241 = vmatprep.subr.mxu0 %v1541_v1 }
 0x3e1   : > { %1242 = vmatpush3.msra.mxu0 %v749_v8 }
 0x3e2   : > { %1243 = vmatprep.subr.mxu0 %v1541_v1 }
 0x3e3   : > { %1244 = vmatpush3.msra.mxu0 %v748_v9 }
 0x3e4   : > { %1245 = vmatprep.subr.mxu0 %v1541_v1 }
 0x3e5   : > { %1246 = vmatpush3.msra.mxu0 %v747_v10 }
 0x3e6   : > { %1247 = vmatprep.subr.mxu0 %v1541_v1 }
 0x3e7   : > { %1248 = vmatpush3.msra.mxu0 %v746_v11 }
 0x3e8   : > { %1249 = vmatprep.subr.mxu0 %v1541_v1 }
 0x3e9   : > { %1250 = vmatpush3.msra.mxu0 %v745_v12 }
 0x3ea   : > { %1251 = vmatprep.subr.mxu0 %v1541_v1 }
 0x3eb   : > { %1252 = vmatpush3.msra.mxu0 %v744_v13 }
 0x3ec   : > { %1253 = vmatprep.subr.mxu0 %v1541_v1 }
 0x3ed   : > { %1254 = vmatpush3.msra.mxu0 %v743_v14 }
 0x3ee   : > { %1255 = vmatprep.subr.mxu0 %v1541_v1 }
 0x3ef   : > { %1256 = vmatpush3.msra.mxu0 %v742_v15 }
 0x3f0   : > { %1257 = vmatprep.subr.mxu0 %v1541_v1 }
 0x3f1   : > { %1258 = vmatpush3.msra.mxu0 %v741_v16 }
 0x3f2   : > { %1260 = vmatmul.mubr.f32.vlgmr.msra.gmra.mxu0 %v1353_v63 }
 0x4b2   : > { %v830_v18 = vpop.f32.mrf.mxu0 }
 0x4b3   : > { %v831_v19 = vadd.f32 %v938_v17, %v830_v18 }
 0x4b4   : > { %v1261_v20 = vpop.f32.mrf.mxu0 }
 0x4b5   : > { %834 = vst [vmem:[#allocation12] sm:$0xff] %v831_v19 }
 0x4b6 PF: > { %p1301_p2 = scmp.eq.s32.totalorder %s1598_s25, 1  ;;  %s1543_s16 = smov [#allocation12]  }
 0x4b7   : > { %s842_s17 = sshll.u32 %s1543_s16, 4  ;;  %s843_s17 = int_to_ptr.vmem [resolvable:$true] %s842_s17 }
 0x4b8   : > { %s1460_s18 = scalar_lea.vmem %s843_s17, 128  ;;  %p1467_p12 = scmp.lt.s32.totalorder %s843_s17, %s843_s17 }
 0x4b9   : > { %p1461_p3 = scmp.ne.s32.totalorder %s843_s17, %s1460_s18  ;;  %p1468_p13 = scmp.lt.s32.totalorder %s1460_s18, %s1460_s18 }
 0x4bb   : > { %p1462_p7 = pnand %p1461_p3, %p1301_p2  ;;  %p1469_p4 = por %p1468_p13, %p1467_p12 }
 0x4bd   : > { %p1463_p10 = pneg %p1462_p7 }
 0x4bf   : > { %p1470_p1 = pnand %p1469_p4, %p1463_p10 }
 0x4c1   : > { %1473 = shalt.err (!%p1470_p1)
}
 0x4c2   : > { %1277 = dma.vmem_to_hbm [thread:$0]  (%p1301_p2), %s843_s17, 128, %s1937_s6, [#allocation6]  }
 0x4c3   : > { %1513 = dma.done.wait (%p1301_p2), [#allocation6], 128  }
 0x4c4   : > { %1515 = vsyncadd (%p1301_p2), [#allocation6], 4294967168 }
 0x4c5 PF: > { %p19_p5 = scmp.ge.s32.totalorder %s1659_s28, 4   ;;  %s1952_s21 = smov %s1522_s22 }
 0x4c6   : > { %s1953_s22 = smov %s1526_s23  ;;  %s1954_s23 = smov %s1669_s7 }
 0x4c7   : > { %s1955_s24 = smov %s1659_s28  ;;  %21 = sbr.rel (!%p19_p5) target bundleno = 6 (0x6), region = 104 }
 0x4cc   :  { %855 = vsyncpa [#allocation5], 1 }
 0x4cd   :  { %857 = vsyncpa [#allocation5 + $0x1], 1 }
 0x4ce   :  { %858 = vsyncpa [#allocation8], 1 }
 0x4cf   :  { %859 = vsyncpa [#allocation11], 1 }
 0x4d0   :  { %860 = vsyncpa [#allocation6], 1 }
 0x4d1   :  { %862 = vsyncpa [#allocation6 + $0x1], 1 }

</bundles_post_ra>
